<compile_context>
chip_gen: v6e
topology: v6e:2x2x1
jax: 0.10.0
libtpu: 0.0.40
codegen_flags: <defaults>
</compile_context>

<pallas_src>
import functools

import jax
import jax.numpy as jnp
from jax.experimental import pallas as pl
from jax.experimental.pallas import tpu as pltpu


def _gru_chunk_kernel(gx_ref, whh_ref, bgh_ref, hs_ref, h_scratch, *,
                      t_chunk, hidden, compute_dtype):
    """One grid step == t_chunk GRU time steps; recurrent state lives in VMEM scratch.

    gx_ref  : (t_chunk, B, 3H) f32   precomputed x-side gate pre-activations
                                     (b_ih+b_hh folded for r,z; b_ih folded for n)
    whh_ref : (H, 3H) compute_dtype  concatenated hidden-to-hidden weights [r|z|n]
    bgh_ref : (1, 3H) f32            [0 | 0 | b_hh_n]  (n-gate b_hh stays inside r*(.))
    hs_ref  : (t_chunk, B, H)        relu(h_t) for every step in the chunk
    """
    H = hidden

    @pl.when(pl.program_id(0) == 0)
    def _():  # PyTorch default h0 = zeros
        h_scratch[...] = jnp.zeros_like(h_scratch)

    w_cat = whh_ref[...]       # (H, 3H) -> single MXU push per step
    b_gh = bgh_ref[...]        # (1, 3H) broadcasts over batch

    def step(t, h):
        # ONE fused matmul for all three gates (vs. three small (H,H) matmuls sitting on
        # the serial recurrence critical path).  f32 accumulation regardless of operands.
        gh = jnp.dot(h.astype(compute_dtype), w_cat,
                     preferred_element_type=jnp.float32) + b_gh          # (B, 3H)
        gx = gx_ref[t]                                                   # (B, 3H) f32
        rz = jax.nn.sigmoid(gx[:, :2 * H] + gh[:, :2 * H])               # r|z in one slab
        r = rz[:, :H]
        z = rz[:, H:]
        n = jnp.tanh(gx[:, 2 * H:] + r * gh[:, 2 * H:])
        h_new = (1.0 - z) * n + z * h
        # Fused ReLU on the encoder output (free VPU work inside the chunk).
        hs_ref[t] = jnp.maximum(h_new, 0.0).astype(hs_ref.dtype)
        return h_new

    # Fixed trip count -> fully unrolled so the LLO scheduler can overlap MXU / EUP
    # (sigmoid, tanh) / VPU work across consecutive time steps.
    h_scratch[...] = jax.lax.fori_loop(0, t_chunk, step, h_scratch[...], unroll=True)


@functools.partial(jax.jit, static_argnames=("t_chunk", "compute_dtype"))
def vencoder_forward(x, params, *, t_chunk=32, compute_dtype=jnp.bfloat16):
    """x: (batch, seq, input_channels) f32 -> (z_mean, z_var), each (batch, seq, latent)."""
    w_ih, b_ih = params["w_ih"], params["b_ih"]          # (C, 3H), (3H,)
    w_hh, b_hh = params["w_hh"], params["b_hh"]          # (H, 3H), (3H,)
    w_mean, b_mean = params["w_mean"], params["b_mean"]  # (H, O), (O,)
    w_var, b_var = params["w_var"], params["b_var"]      # (H, O), (O,)

    B, S, C = x.shape
    H = w_hh.shape[0]
    O = w_mean.shape[1]
    cdt = jnp.dtype(compute_dtype)
    store_dtype = cdt                                    # hs writeback / head-GEMM reads

    # Explicit VMEM working-set budget for the chunk size (double-buffered gx input in f32
    # plus hs output in the store dtype).  16 MiB leaves comfortable headroom under the
    # 32 MiB scoped default on v6e/v7x (v7x physical VMEM is only 64 MiB).
    bytes_per_step = 2 * (B * 3 * H * 4 + B * H * store_dtype.itemsize)
    vmem_budget = 16 * 1024 * 1024
    t_chunk = int(max(1, min(t_chunk, S, vmem_budget // max(bytes_per_step, 1))))

    n_chunks = pl.cdiv(S, t_chunk)
    S_pad = n_chunks * t_chunk

    # Time-major (S, B, C); pad the *end* of time (GRU is causal -> padded steps never
    # influence real outputs, and they are sliced off below).
    x_tm = jnp.transpose(x, (1, 0, 2))
    if S_pad != S:
        x_tm = jnp.pad(x_tm, ((0, S_pad - S), (0, 0), (0, 0)))

    # ---- Hoisted input projection: one big time-folded GEMM -> single fused (.., 3H) gx.
    # Fold biases: r,z get b_ih + b_hh; n gets only b_ih (its b_hh stays in-kernel,
    # inside r * (h @ W_hn + b_hh_n)).
    gx_bias = jnp.concatenate([b_ih[:2 * H] + b_hh[:2 * H], b_ih[2 * H:]])
    gx = (jnp.dot(x_tm.reshape(S_pad * B, C).astype(cdt), w_ih.astype(cdt),
                  preferred_element_type=jnp.float32)
          + gx_bias).reshape(S_pad, B, 3 * H)                          # f32

    # Concatenated hidden-to-hidden weights -> one ref, one MXU matmul per step.
    whh_c = w_hh.astype(cdt)                                           # (H, 3H)
    b_gh = jnp.concatenate([jnp.zeros((2 * H,), jnp.float32),
                            b_hh[2 * H:]]).reshape(1, 3 * H)           # [0 | 0 | b_hh_n]

    kernel = functools.partial(_gru_chunk_kernel, t_chunk=t_chunk, hidden=H,
                               compute_dtype=cdt)

    hs = pl.pallas_call(
        kernel,
        out_shape=jax.ShapeDtypeStruct((S_pad, B, H), store_dtype),
        grid_spec=pltpu.PrefetchScalarGridSpec(
            num_scalar_prefetch=0,
            grid=(n_chunks,),
            in_specs=[
                pl.BlockSpec((t_chunk, B, 3 * H), lambda c: (c, 0, 0)),  # fused gx chunk
                pl.BlockSpec((H, 3 * H), lambda c: (0, 0)),              # W_hh [r|z|n]
                pl.BlockSpec((1, 3 * H), lambda c: (0, 0)),              # [0|0|b_hh_n]
            ],
            out_specs=pl.BlockSpec((t_chunk, B, H), lambda c: (c, 0, 0)),
            scratch_shapes=[pltpu.VMEM((B, H), jnp.float32)],            # recurrent state
        ),
        compiler_params=pltpu.CompilerParams(
            # Recurrence: the grid axis MUST stay sequential ("arbitrary") because
            # h_scratch carries state across grid steps.
            # TODO(synk): on v7x (2 TCs) add a leading batch-shard axis marked "parallel"
            # with a per-shard h_scratch once B is large enough to tile (>= 8 per shard).
            dimension_semantics=("arbitrary",),
            vmem_limit_bytes=32 * 1024 * 1024,
        ),
    )(gx, whh_c, b_gh)

    # ---- Hoisted + fused z_mean|z_var head: one (S*B, H) x (H, 2O) GEMM.
    hs2d = hs[:S].reshape(S * B, H)
    w_head = jnp.concatenate([w_mean, w_var], axis=1).astype(cdt)      # (H, 2O)
    b_head = jnp.concatenate([b_mean, b_var])                          # (2O,)
    zhead = jnp.dot(hs2d, w_head, preferred_element_type=jnp.float32) + b_head
    zhead = jnp.transpose(zhead.reshape(S, B, 2 * O), (1, 0, 2))       # (B, S, 2O) f32
    return zhead[..., :O], zhead[..., O:]


def init_params(key, input_channels, hidden_size, latent_dims):
    """Deterministic synthetic init mirroring PyTorch shapes (stored pre-transposed)."""
    k = jax.random.split(key, 8)
    H = hidden_size
    s = 1.0 / jnp.sqrt(H)
    w_ih = jax.random.uniform(k[0], (input_channels, 3 * H), jnp.float32, -s, s)
    w_hh = jax.random.uniform(k[1], (H, 3 * H), jnp.float32, -s, s)
    b_ih = jax.random.uniform(k[2], (3 * H,), jnp.float32, -s, s)
    b_hh = jax.random.uniform(k[3], (3 * H,), jnp.float32, -s, s)
    w_mean = jax.random.uniform(k[4], (H, latent_dims), jnp.float32, -s, s)
    b_mean = jax.random.uniform(k[5], (latent_dims,), jnp.float32, -s, s)
    w_var = jax.random.uniform(k[6], (H, latent_dims), jnp.float32, -s, s)
    b_var = jax.random.uniform(k[7], (latent_dims,), jnp.float32, -s, s)
    return dict(w_ih=w_ih, w_hh=w_hh, b_ih=b_ih, b_hh=b_hh,
                w_mean=w_mean, b_mean=b_mean, w_var=w_var, b_var=b_var)


def reference_forward(x, params):
    """Pure-JAX reference (lax.scan GRU + relu + heads) for correctness checking."""
    w_ih, b_ih = params["w_ih"], params["b_ih"]
    w_hh, b_hh = params["w_hh"], params["b_hh"]
    B = x.shape[0]
    H = w_hh.shape[0]

    def step(h, x_t):
        gx = x_t @ w_ih + b_ih
        gh = h @ w_hh + b_hh
        r = jax.nn.sigmoid(gx[:, :H] + gh[:, :H])
        z = jax.nn.sigmoid(gx[:, H:2 * H] + gh[:, H:2 * H])
        n = jnp.tanh(gx[:, 2 * H:] + r * gh[:, 2 * H:])
        h_new = (1.0 - z) * n + z * h
        return h_new, h_new

    h0 = jnp.zeros((B, H), jnp.float32)
    _, hs = jax.lax.scan(step, h0, jnp.transpose(x, (1, 0, 2)))   # (S, B, H)
    hs = jnp.maximum(hs, 0.0)
    zm = hs @ params["w_mean"] + params["b_mean"]
    zv = hs @ params["w_var"] + params["b_var"]
    return jnp.transpose(zm, (1, 0, 2)), jnp.transpose(zv, (1, 0, 2))


if __name__ == "__main__":
    input_channels, hidden_size, latent_dims = 4, 32, 16
    batch, seq = 2, 8

    key = jax.random.PRNGKey(0)
    kx, kp = jax.random.split(key)
    x = jax.random.normal(kx, (batch, seq, input_channels), jnp.float32)
    params = init_params(kp, input_channels, hidden_size, latent_dims)

    zm_ref, zv_ref = reference_forward(x, params)

    # f32 MXU operands: tight correctness check vs the pure-JAX reference.
    zm32, zv32 = vencoder_forward(x, params, compute_dtype=jnp.float32)
    zm32, zv32 = jax.block_until_ready((zm32, zv32))
    assert zm32.shape == (batch, seq, latent_dims), zm32.shape
    assert zv32.shape == (batch, seq, latent_dims), zv32.shape
    assert jnp.allclose(zm32, zm_ref, rtol=1e-3, atol=1e-3), "z_mean mismatch (f32)"
    assert jnp.allclose(zv32, zv_ref, rtol=1e-3, atol=1e-3), "z_var mismatch (f32)"

    # Default path (bf16 MXU operands, f32 accumulation / gate math): loose sanity check,
    # since bf16 rounding compounds through the recurrence (per review note).
    zmb, zvb = vencoder_forward(x, params)
    zmb, zvb = jax.block_until_ready((zmb, zvb))
    assert jnp.allclose(zmb, zm_ref, rtol=1e-1, atol=1e-1), "z_mean mismatch (bf16)"
    assert jnp.allclose(zvb, zv_ref, rtol=1e-1, atol=1e-1), "z_var mismatch (bf16)"

    print("KERNEL_OK")
</pallas_src>

<mosaic_0001>
module attributes {stable_mosaic.version = 11 : i64} {
  func.func @_gru_chunk_kernel(%arg0: i32, %arg1: memref<8x2x96xf32, #tpu.memory_space<vmem>>, %arg2: memref<32x96xf32, #tpu.memory_space<vmem>>, %arg3: memref<1x96xf32, #tpu.memory_space<vmem>>, %arg4: memref<8x2x32xf32, #tpu.memory_space<vmem>>, %arg5: memref<2x32xf32, #tpu.memory_space<vmem>>) attributes {dimension_semantics = [#tpu.dimension_semantics<arbitrary>], iteration_bounds = array<i64: 1>, scalar_prefetch = 0 : i64, scratch_operands = 1 : i64, tpu.core_type = #tpu.core_type<tc>, window_params = [{transform_indices = @transform_0, window_bounds = array<i64: 8, 2, 96>}, {pipeline_mode = #tpu.pipeline_mode<synchronous>, transform_indices = @transform_1, window_bounds = array<i64: 32, 96>}, {pipeline_mode = #tpu.pipeline_mode<synchronous>, transform_indices = @transform_2, window_bounds = array<i64: 1, 96>}, {transform_indices = @transform_3, window_bounds = array<i64: 8, 2, 32>}]} {
    %c0_i32 = arith.constant 0 : i32
    %0 = arith.cmpi eq, %arg0, %c0_i32 : i32
    %1 = arith.extui %0 : i1 to i32
    %c0_i32_0 = arith.constant 0 : i32
    %2 = arith.cmpi ne, %1, %c0_i32_0 : i32
    scf.if %2 {
      %cst_72 = arith.constant 0.000000e+00 : f32
      %263 = vector.broadcast %cst_72 : f32 to vector<2x32xf32>
      %c0_73 = arith.constant 0 : index
      %c0_74 = arith.constant 0 : index
      %264 = vector.load %arg5[%c0_73, %c0_74] : memref<2x32xf32, #tpu.memory_space<vmem>>, vector<2x32xf32>
      tpu.vector_store %arg5[%c0_73, %c0_74], %263 {strides = array<i32>} : memref<2x32xf32, #tpu.memory_space<vmem>>, vector<2x32xf32>,
    } else {
    }
    %c0 = arith.constant 0 : index
    %c0_1 = arith.constant 0 : index
    %3 = vector.load %arg2[%c0, %c0_1] : memref<32x96xf32, #tpu.memory_space<vmem>>, vector<32x96xf32>
    %c0_2 = arith.constant 0 : index
    %c0_3 = arith.constant 0 : index
    %4 = vector.load %arg3[%c0_2, %c0_3] : memref<1x96xf32, #tpu.memory_space<vmem>>, vector<1x96xf32>
    %c0_4 = arith.constant 0 : index
    %c0_5 = arith.constant 0 : index
    %5 = vector.load %arg5[%c0_4, %c0_5] : memref<2x32xf32, #tpu.memory_space<vmem>>, vector<2x32xf32>
    %c0_i32_6 = arith.constant 0 : i32
    %cst = arith.constant dense<0.000000e+00> : vector<2x96xf32>
    %6 = tpu.matmul %5, %3, %cst {dimension_numbers = #tpu.dot_dimension_numbers<[1], [0], [0], [1], [0, 0, 1, 1], [], []>} : vector<2x32xf32>, vector<32x96xf32>, vector<2x96xf32> -> vector<2x96xf32>
    %7 = vector.broadcast %4 : vector<1x96xf32> to vector<2x96xf32>
    %8 = arith.addf %6, %7 : vector<2x96xf32>
    %9 = arith.index_cast %c0_i32_6 : i32 to index
    %c0_7 = arith.constant 0 : index
    %c0_8 = arith.constant 0 : index
    %10 = vector.load %arg1[%9, %c0_7, %c0_8] : memref<8x2x96xf32, #tpu.memory_space<vmem>>, vector<1x2x96xf32>
    %11 = vector.shape_cast %10 : vector<1x2x96xf32> to vector<2x96xf32>
    %12 = vector.extract_strided_slice %11 {offsets = [0, 0], sizes = [2, 64], strides = [1, 1]} : vector<2x96xf32> to vector<2x64xf32>
    %13 = vector.extract_strided_slice %8 {offsets = [0, 0], sizes = [2, 64], strides = [1, 1]} : vector<2x96xf32> to vector<2x64xf32>
    %14 = arith.addf %12, %13 : vector<2x64xf32>
    %15 = arith.negf %14 : vector<2x64xf32>
    %16 = math.exp %15 : vector<2x64xf32>
    %cst_9 = arith.constant 1.000000e+00 : f32
    %17 = vector.broadcast %cst_9 : f32 to vector<2x64xf32>
    %18 = arith.addf %17, %16 : vector<2x64xf32>
    %19 = arith.divf %17, %18 : vector<2x64xf32>
    %20 = vector.extract_strided_slice %19 {offsets = [0, 0], sizes = [2, 32], strides = [1, 1]} : vector<2x64xf32> to vector<2x32xf32>
    %21 = vector.extract_strided_slice %19 {offsets = [0, 32], sizes = [2, 32], strides = [1, 1]} : vector<2x64xf32> to vector<2x32xf32>
    %22 = vector.extract_strided_slice %11 {offsets = [0, 64], sizes = [2, 32], strides = [1, 1]} : vector<2x96xf32> to vector<2x32xf32>
    %23 = vector.extract_strided_slice %8 {offsets = [0, 64], sizes = [2, 32], strides = [1, 1]} : vector<2x96xf32> to vector<2x32xf32>
    %24 = arith.mulf %20, %23 : vector<2x32xf32>
    %25 = arith.addf %22, %24 : vector<2x32xf32>
    %26 = math.tanh %25 : vector<2x32xf32>
    %cst_10 = arith.constant 1.000000e+00 : f32
    %27 = vector.broadcast %cst_10 : f32 to vector<2x32xf32>
    %28 = arith.subf %27, %21 : vector<2x32xf32>
    %29 = arith.mulf %28, %26 : vector<2x32xf32>
    %30 = arith.mulf %21, %5 : vector<2x32xf32>
    %31 = arith.addf %29, %30 : vector<2x32xf32>
    %cst_11 = arith.constant 0.000000e+00 : f32
    %32 = vector.broadcast %cst_11 : f32 to vector<2x32xf32>
    %33 = arith.maximumf %31, %32 : vector<2x32xf32>
    %34 = arith.index_cast %c0_i32_6 : i32 to index
    %c0_12 = arith.constant 0 : index
    %c0_13 = arith.constant 0 : index
    %35 = vector.load %arg4[%34, %c0_12, %c0_13] : memref<8x2x32xf32, #tpu.memory_space<vmem>>, vector<1x2x32xf32>
    %36 = vector.shape_cast %35 : vector<1x2x32xf32> to vector<2x32xf32>
    %37 = vector.shape_cast %33 : vector<2x32xf32> to vector<1x2x32xf32>
    tpu.vector_store %arg4[%34, %c0_12, %c0_13], %37 {strides = array<i32>} : memref<8x2x32xf32, #tpu.memory_space<vmem>>, vector<1x2x32xf32>,
    %c1_i32 = arith.constant 1 : i32
    %cst_14 = arith.constant dense<0.000000e+00> : vector<2x96xf32>
    %38 = tpu.matmul %31, %3, %cst_14 {dimension_numbers = #tpu.dot_dimension_numbers<[1], [0], [0], [1], [0, 0, 1, 1], [], []>} : vector<2x32xf32>, vector<32x96xf32>, vector<2x96xf32> -> vector<2x96xf32>
    %39 = vector.broadcast %4 : vector<1x96xf32> to vector<2x96xf32>
    %40 = arith.addf %38, %39 : vector<2x96xf32>
    %41 = arith.index_cast %c1_i32 : i32 to index
    %c0_15 = arith.constant 0 : index
    %c0_16 = arith.constant 0 : index
    %42 = vector.load %arg1[%41, %c0_15, %c0_16] : memref<8x2x96xf32, #tpu.memory_space<vmem>>, vector<1x2x96xf32>
    %43 = vector.shape_cast %42 : vector<1x2x96xf32> to vector<2x96xf32>
    %44 = vector.extract_strided_slice %43 {offsets = [0, 0], sizes = [2, 64], strides = [1, 1]} : vector<2x96xf32> to vector<2x64xf32>
    %45 = vector.extract_strided_slice %40 {offsets = [0, 0], sizes = [2, 64], strides = [1, 1]} : vector<2x96xf32> to vector<2x64xf32>
    %46 = arith.addf %44, %45 : vector<2x64xf32>
    %47 = arith.negf %46 : vector<2x64xf32>
    %48 = math.exp %47 : vector<2x64xf32>
    %cst_17 = arith.constant 1.000000e+00 : f32
    %49 = vector.broadcast %cst_17 : f32 to vector<2x64xf32>
    %50 = arith.addf %49, %48 : vector<2x64xf32>
    %51 = arith.divf %49, %50 : vector<2x64xf32>
    %52 = vector.extract_strided_slice %51 {offsets = [0, 0], sizes = [2, 32], strides = [1, 1]} : vector<2x64xf32> to vector<2x32xf32>
    %53 = vector.extract_strided_slice %51 {offsets = [0, 32], sizes = [2, 32], strides = [1, 1]} : vector<2x64xf32> to vector<2x32xf32>
    %54 = vector.extract_strided_slice %43 {offsets = [0, 64], sizes = [2, 32], strides = [1, 1]} : vector<2x96xf32> to vector<2x32xf32>
    %55 = vector.extract_strided_slice %40 {offsets = [0, 64], sizes = [2, 32], strides = [1, 1]} : vector<2x96xf32> to vector<2x32xf32>
    %56 = arith.mulf %52, %55 : vector<2x32xf32>
    %57 = arith.addf %54, %56 : vector<2x32xf32>
    %58 = math.tanh %57 : vector<2x32xf32>
    %cst_18 = arith.constant 1.000000e+00 : f32
    %59 = vector.broadcast %cst_18 : f32 to vector<2x32xf32>
    %60 = arith.subf %59, %53 : vector<2x32xf32>
    %61 = arith.mulf %60, %58 : vector<2x32xf32>
    %62 = arith.mulf %53, %31 : vector<2x32xf32>
    %63 = arith.addf %61, %62 : vector<2x32xf32>
    %cst_19 = arith.constant 0.000000e+00 : f32
    %64 = vector.broadcast %cst_19 : f32 to vector<2x32xf32>
    %65 = arith.maximumf %63, %64 : vector<2x32xf32>
    %66 = arith.index_cast %c1_i32 : i32 to index
    %c0_20 = arith.constant 0 : index
    %c0_21 = arith.constant 0 : index
    %67 = vector.load %arg4[%66, %c0_20, %c0_21] : memref<8x2x32xf32, #tpu.memory_space<vmem>>, vector<1x2x32xf32>
    %68 = vector.shape_cast %67 : vector<1x2x32xf32> to vector<2x32xf32>
    %69 = vector.shape_cast %65 : vector<2x32xf32> to vector<1x2x32xf32>
    tpu.vector_store %arg4[%66, %c0_20, %c0_21], %69 {strides = array<i32>} : memref<8x2x32xf32, #tpu.memory_space<vmem>>, vector<1x2x32xf32>,
    %c2_i32 = arith.constant 2 : i32
    %cst_22 = arith.constant dense<0.000000e+00> : vector<2x96xf32>
    %70 = tpu.matmul %63, %3, %cst_22 {dimension_numbers = #tpu.dot_dimension_numbers<[1], [0], [0], [1], [0, 0, 1, 1], [], []>} : vector<2x32xf32>, vector<32x96xf32>, vector<2x96xf32> -> vector<2x96xf32>
    %71 = vector.broadcast %4 : vector<1x96xf32> to vector<2x96xf32>
    %72 = arith.addf %70, %71 : vector<2x96xf32>
    %73 = arith.index_cast %c2_i32 : i32 to index
    %c0_23 = arith.constant 0 : index
    %c0_24 = arith.constant 0 : index
    %74 = vector.load %arg1[%73, %c0_23, %c0_24] : memref<8x2x96xf32, #tpu.memory_space<vmem>>, vector<1x2x96xf32>
    %75 = vector.shape_cast %74 : vector<1x2x96xf32> to vector<2x96xf32>
    %76 = vector.extract_strided_slice %75 {offsets = [0, 0], sizes = [2, 64], strides = [1, 1]} : vector<2x96xf32> to vector<2x64xf32>
    %77 = vector.extract_strided_slice %72 {offsets = [0, 0], sizes = [2, 64], strides = [1, 1]} : vector<2x96xf32> to vector<2x64xf32>
    %78 = arith.addf %76, %77 : vector<2x64xf32>
    %79 = arith.negf %78 : vector<2x64xf32>
    %80 = math.exp %79 : vector<2x64xf32>
    %cst_25 = arith.constant 1.000000e+00 : f32
    %81 = vector.broadcast %cst_25 : f32 to vector<2x64xf32>
    %82 = arith.addf %81, %80 : vector<2x64xf32>
    %83 = arith.divf %81, %82 : vector<2x64xf32>
    %84 = vector.extract_strided_slice %83 {offsets = [0, 0], sizes = [2, 32], strides = [1, 1]} : vector<2x64xf32> to vector<2x32xf32>
    %85 = vector.extract_strided_slice %83 {offsets = [0, 32], sizes = [2, 32], strides = [1, 1]} : vector<2x64xf32> to vector<2x32xf32>
    %86 = vector.extract_strided_slice %75 {offsets = [0, 64], sizes = [2, 32], strides = [1, 1]} : vector<2x96xf32> to vector<2x32xf32>
    %87 = vector.extract_strided_slice %72 {offsets = [0, 64], sizes = [2, 32], strides = [1, 1]} : vector<2x96xf32> to vector<2x32xf32>
    %88 = arith.mulf %84, %87 : vector<2x32xf32>
    %89 = arith.addf %86, %88 : vector<2x32xf32>
    %90 = math.tanh %89 : vector<2x32xf32>
    %cst_26 = arith.constant 1.000000e+00 : f32
    %91 = vector.broadcast %cst_26 : f32 to vector<2x32xf32>
    %92 = arith.subf %91, %85 : vector<2x32xf32>
    %93 = arith.mulf %92, %90 : vector<2x32xf32>
    %94 = arith.mulf %85, %63 : vector<2x32xf32>
    %95 = arith.addf %93, %94 : vector<2x32xf32>
    %cst_27 = arith.constant 0.000000e+00 : f32
    %96 = vector.broadcast %cst_27 : f32 to vector<2x32xf32>
    %97 = arith.maximumf %95, %96 : vector<2x32xf32>
    %98 = arith.index_cast %c2_i32 : i32 to index
    %c0_28 = arith.constant 0 : index
    %c0_29 = arith.constant 0 : index
    %99 = vector.load %arg4[%98, %c0_28, %c0_29] : memref<8x2x32xf32, #tpu.memory_space<vmem>>, vector<1x2x32xf32>
    %100 = vector.shape_cast %99 : vector<1x2x32xf32> to vector<2x32xf32>
    %101 = vector.shape_cast %97 : vector<2x32xf32> to vector<1x2x32xf32>
    tpu.vector_store %arg4[%98, %c0_28, %c0_29], %101 {strides = array<i32>} : memref<8x2x32xf32, #tpu.memory_space<vmem>>, vector<1x2x32xf32>,
    %c3_i32 = arith.constant 3 : i32
    %cst_30 = arith.constant dense<0.000000e+00> : vector<2x96xf32>
    %102 = tpu.matmul %95, %3, %cst_30 {dimension_numbers = #tpu.dot_dimension_numbers<[1], [0], [0], [1], [0, 0, 1, 1], [], []>} : vector<2x32xf32>, vector<32x96xf32>, vector<2x96xf32> -> vector<2x96xf32>
    %103 = vector.broadcast %4 : vector<1x96xf32> to vector<2x96xf32>
    %104 = arith.addf %102, %103 : vector<2x96xf32>
    %105 = arith.index_cast %c3_i32 : i32 to index
    %c0_31 = arith.constant 0 : index
    %c0_32 = arith.constant 0 : index
    %106 = vector.load %arg1[%105, %c0_31, %c0_32] : memref<8x2x96xf32, #tpu.memory_space<vmem>>, vector<1x2x96xf32>
    %107 = vector.shape_cast %106 : vector<1x2x96xf32> to vector<2x96xf32>
    %108 = vector.extract_strided_slice %107 {offsets = [0, 0], sizes = [2, 64], strides = [1, 1]} : vector<2x96xf32> to vector<2x64xf32>
    %109 = vector.extract_strided_slice %104 {offsets = [0, 0], sizes = [2, 64], strides = [1, 1]} : vector<2x96xf32> to vector<2x64xf32>
    %110 = arith.addf %108, %109 : vector<2x64xf32>
    %111 = arith.negf %110 : vector<2x64xf32>
    %112 = math.exp %111 : vector<2x64xf32>
    %cst_33 = arith.constant 1.000000e+00 : f32
    %113 = vector.broadcast %cst_33 : f32 to vector<2x64xf32>
    %114 = arith.addf %113, %112 : vector<2x64xf32>
    %115 = arith.divf %113, %114 : vector<2x64xf32>
    %116 = vector.extract_strided_slice %115 {offsets = [0, 0], sizes = [2, 32], strides = [1, 1]} : vector<2x64xf32> to vector<2x32xf32>
    %117 = vector.extract_strided_slice %115 {offsets = [0, 32], sizes = [2, 32], strides = [1, 1]} : vector<2x64xf32> to vector<2x32xf32>
    %118 = vector.extract_strided_slice %107 {offsets = [0, 64], sizes = [2, 32], strides = [1, 1]} : vector<2x96xf32> to vector<2x32xf32>
    %119 = vector.extract_strided_slice %104 {offsets = [0, 64], sizes = [2, 32], strides = [1, 1]} : vector<2x96xf32> to vector<2x32xf32>
    %120 = arith.mulf %116, %119 : vector<2x32xf32>
    %121 = arith.addf %118, %120 : vector<2x32xf32>
    %122 = math.tanh %121 : vector<2x32xf32>
    %cst_34 = arith.constant 1.000000e+00 : f32
    %123 = vector.broadcast %cst_34 : f32 to vector<2x32xf32>
    %124 = arith.subf %123, %117 : vector<2x32xf32>
    %125 = arith.mulf %124, %122 : vector<2x32xf32>
    %126 = arith.mulf %117, %95 : vector<2x32xf32>
    %127 = arith.addf %125, %126 : vector<2x32xf32>
    %cst_35 = arith.constant 0.000000e+00 : f32
    %128 = vector.broadcast %cst_35 : f32 to vector<2x32xf32>
    %129 = arith.maximumf %127, %128 : vector<2x32xf32>
    %130 = arith.index_cast %c3_i32 : i32 to index
    %c0_36 = arith.constant 0 : index
    %c0_37 = arith.constant 0 : index
    %131 = vector.load %arg4[%130, %c0_36, %c0_37] : memref<8x2x32xf32, #tpu.memory_space<vmem>>, vector<1x2x32xf32>
    %132 = vector.shape_cast %131 : vector<1x2x32xf32> to vector<2x32xf32>
    %133 = vector.shape_cast %129 : vector<2x32xf32> to vector<1x2x32xf32>
    tpu.vector_store %arg4[%130, %c0_36, %c0_37], %133 {strides = array<i32>} : memref<8x2x32xf32, #tpu.memory_space<vmem>>, vector<1x2x32xf32>,
    %c4_i32 = arith.constant 4 : i32
    %cst_38 = arith.constant dense<0.000000e+00> : vector<2x96xf32>
    %134 = tpu.matmul %127, %3, %cst_38 {dimension_numbers = #tpu.dot_dimension_numbers<[1], [0], [0], [1], [0, 0, 1, 1], [], []>} : vector<2x32xf32>, vector<32x96xf32>, vector<2x96xf32> -> vector<2x96xf32>
    %135 = vector.broadcast %4 : vector<1x96xf32> to vector<2x96xf32>
    %136 = arith.addf %134, %135 : vector<2x96xf32>
    %137 = arith.index_cast %c4_i32 : i32 to index
    %c0_39 = arith.constant 0 : index
    %c0_40 = arith.constant 0 : index
    %138 = vector.load %arg1[%137, %c0_39, %c0_40] : memref<8x2x96xf32, #tpu.memory_space<vmem>>, vector<1x2x96xf32>
    %139 = vector.shape_cast %138 : vector<1x2x96xf32> to vector<2x96xf32>
    %140 = vector.extract_strided_slice %139 {offsets = [0, 0], sizes = [2, 64], strides = [1, 1]} : vector<2x96xf32> to vector<2x64xf32>
    %141 = vector.extract_strided_slice %136 {offsets = [0, 0], sizes = [2, 64], strides = [1, 1]} : vector<2x96xf32> to vector<2x64xf32>
    %142 = arith.addf %140, %141 : vector<2x64xf32>
    %143 = arith.negf %142 : vector<2x64xf32>
    %144 = math.exp %143 : vector<2x64xf32>
    %cst_41 = arith.constant 1.000000e+00 : f32
    %145 = vector.broadcast %cst_41 : f32 to vector<2x64xf32>
    %146 = arith.addf %145, %144 : vector<2x64xf32>
    %147 = arith.divf %145, %146 : vector<2x64xf32>
    %148 = vector.extract_strided_slice %147 {offsets = [0, 0], sizes = [2, 32], strides = [1, 1]} : vector<2x64xf32> to vector<2x32xf32>
    %149 = vector.extract_strided_slice %147 {offsets = [0, 32], sizes = [2, 32], strides = [1, 1]} : vector<2x64xf32> to vector<2x32xf32>
    %150 = vector.extract_strided_slice %139 {offsets = [0, 64], sizes = [2, 32], strides = [1, 1]} : vector<2x96xf32> to vector<2x32xf32>
    %151 = vector.extract_strided_slice %136 {offsets = [0, 64], sizes = [2, 32], strides = [1, 1]} : vector<2x96xf32> to vector<2x32xf32>
    %152 = arith.mulf %148, %151 : vector<2x32xf32>
    %153 = arith.addf %150, %152 : vector<2x32xf32>
    %154 = math.tanh %153 : vector<2x32xf32>
    %cst_42 = arith.constant 1.000000e+00 : f32
    %155 = vector.broadcast %cst_42 : f32 to vector<2x32xf32>
    %156 = arith.subf %155, %149 : vector<2x32xf32>
    %157 = arith.mulf %156, %154 : vector<2x32xf32>
    %158 = arith.mulf %149, %127 : vector<2x32xf32>
    %159 = arith.addf %157, %158 : vector<2x32xf32>
    %cst_43 = arith.constant 0.000000e+00 : f32
    %160 = vector.broadcast %cst_43 : f32 to vector<2x32xf32>
    %161 = arith.maximumf %159, %160 : vector<2x32xf32>
    %162 = arith.index_cast %c4_i32 : i32 to index
    %c0_44 = arith.constant 0 : index
    %c0_45 = arith.constant 0 : index
    %163 = vector.load %arg4[%162, %c0_44, %c0_45] : memref<8x2x32xf32, #tpu.memory_space<vmem>>, vector<1x2x32xf32>
    %164 = vector.shape_cast %163 : vector<1x2x32xf32> to vector<2x32xf32>
    %165 = vector.shape_cast %161 : vector<2x32xf32> to vector<1x2x32xf32>
    tpu.vector_store %arg4[%162, %c0_44, %c0_45], %165 {strides = array<i32>} : memref<8x2x32xf32, #tpu.memory_space<vmem>>, vector<1x2x32xf32>,
    %c5_i32 = arith.constant 5 : i32
    %cst_46 = arith.constant dense<0.000000e+00> : vector<2x96xf32>
    %166 = tpu.matmul %159, %3, %cst_46 {dimension_numbers = #tpu.dot_dimension_numbers<[1], [0], [0], [1], [0, 0, 1, 1], [], []>} : vector<2x32xf32>, vector<32x96xf32>, vector<2x96xf32> -> vector<2x96xf32>
    %167 = vector.broadcast %4 : vector<1x96xf32> to vector<2x96xf32>
    %168 = arith.addf %166, %167 : vector<2x96xf32>
    %169 = arith.index_cast %c5_i32 : i32 to index
    %c0_47 = arith.constant 0 : index
    %c0_48 = arith.constant 0 : index
    %170 = vector.load %arg1[%169, %c0_47, %c0_48] : memref<8x2x96xf32, #tpu.memory_space<vmem>>, vector<1x2x96xf32>
    %171 = vector.shape_cast %170 : vector<1x2x96xf32> to vector<2x96xf32>
    %172 = vector.extract_strided_slice %171 {offsets = [0, 0], sizes = [2, 64], strides = [1, 1]} : vector<2x96xf32> to vector<2x64xf32>
    %173 = vector.extract_strided_slice %168 {offsets = [0, 0], sizes = [2, 64], strides = [1, 1]} : vector<2x96xf32> to vector<2x64xf32>
    %174 = arith.addf %172, %173 : vector<2x64xf32>
    %175 = arith.negf %174 : vector<2x64xf32>
    %176 = math.exp %175 : vector<2x64xf32>
    %cst_49 = arith.constant 1.000000e+00 : f32
    %177 = vector.broadcast %cst_49 : f32 to vector<2x64xf32>
    %178 = arith.addf %177, %176 : vector<2x64xf32>
    %179 = arith.divf %177, %178 : vector<2x64xf32>
    %180 = vector.extract_strided_slice %179 {offsets = [0, 0], sizes = [2, 32], strides = [1, 1]} : vector<2x64xf32> to vector<2x32xf32>
    %181 = vector.extract_strided_slice %179 {offsets = [0, 32], sizes = [2, 32], strides = [1, 1]} : vector<2x64xf32> to vector<2x32xf32>
    %182 = vector.extract_strided_slice %171 {offsets = [0, 64], sizes = [2, 32], strides = [1, 1]} : vector<2x96xf32> to vector<2x32xf32>
    %183 = vector.extract_strided_slice %168 {offsets = [0, 64], sizes = [2, 32], strides = [1, 1]} : vector<2x96xf32> to vector<2x32xf32>
    %184 = arith.mulf %180, %183 : vector<2x32xf32>
    %185 = arith.addf %182, %184 : vector<2x32xf32>
    %186 = math.tanh %185 : vector<2x32xf32>
    %cst_50 = arith.constant 1.000000e+00 : f32
    %187 = vector.broadcast %cst_50 : f32 to vector<2x32xf32>
    %188 = arith.subf %187, %181 : vector<2x32xf32>
    %189 = arith.mulf %188, %186 : vector<2x32xf32>
    %190 = arith.mulf %181, %159 : vector<2x32xf32>
    %191 = arith.addf %189, %190 : vector<2x32xf32>
    %cst_51 = arith.constant 0.000000e+00 : f32
    %192 = vector.broadcast %cst_51 : f32 to vector<2x32xf32>
    %193 = arith.maximumf %191, %192 : vector<2x32xf32>
    %194 = arith.index_cast %c5_i32 : i32 to index
    %c0_52 = arith.constant 0 : index
    %c0_53 = arith.constant 0 : index
    %195 = vector.load %arg4[%194, %c0_52, %c0_53] : memref<8x2x32xf32, #tpu.memory_space<vmem>>, vector<1x2x32xf32>
    %196 = vector.shape_cast %195 : vector<1x2x32xf32> to vector<2x32xf32>
    %197 = vector.shape_cast %193 : vector<2x32xf32> to vector<1x2x32xf32>
    tpu.vector_store %arg4[%194, %c0_52, %c0_53], %197 {strides = array<i32>} : memref<8x2x32xf32, #tpu.memory_space<vmem>>, vector<1x2x32xf32>,
    %c6_i32 = arith.constant 6 : i32
    %cst_54 = arith.constant dense<0.000000e+00> : vector<2x96xf32>
    %198 = tpu.matmul %191, %3, %cst_54 {dimension_numbers = #tpu.dot_dimension_numbers<[1], [0], [0], [1], [0, 0, 1, 1], [], []>} : vector<2x32xf32>, vector<32x96xf32>, vector<2x96xf32> -> vector<2x96xf32>
    %199 = vector.broadcast %4 : vector<1x96xf32> to vector<2x96xf32>
    %200 = arith.addf %198, %199 : vector<2x96xf32>
    %201 = arith.index_cast %c6_i32 : i32 to index
    %c0_55 = arith.constant 0 : index
    %c0_56 = arith.constant 0 : index
    %202 = vector.load %arg1[%201, %c0_55, %c0_56] : memref<8x2x96xf32, #tpu.memory_space<vmem>>, vector<1x2x96xf32>
    %203 = vector.shape_cast %202 : vector<1x2x96xf32> to vector<2x96xf32>
    %204 = vector.extract_strided_slice %203 {offsets = [0, 0], sizes = [2, 64], strides = [1, 1]} : vector<2x96xf32> to vector<2x64xf32>
    %205 = vector.extract_strided_slice %200 {offsets = [0, 0], sizes = [2, 64], strides = [1, 1]} : vector<2x96xf32> to vector<2x64xf32>
    %206 = arith.addf %204, %205 : vector<2x64xf32>
    %207 = arith.negf %206 : vector<2x64xf32>
    %208 = math.exp %207 : vector<2x64xf32>
    %cst_57 = arith.constant 1.000000e+00 : f32
    %209 = vector.broadcast %cst_57 : f32 to vector<2x64xf32>
    %210 = arith.addf %209, %208 : vector<2x64xf32>
    %211 = arith.divf %209, %210 : vector<2x64xf32>
    %212 = vector.extract_strided_slice %211 {offsets = [0, 0], sizes = [2, 32], strides = [1, 1]} : vector<2x64xf32> to vector<2x32xf32>
    %213 = vector.extract_strided_slice %211 {offsets = [0, 32], sizes = [2, 32], strides = [1, 1]} : vector<2x64xf32> to vector<2x32xf32>
    %214 = vector.extract_strided_slice %203 {offsets = [0, 64], sizes = [2, 32], strides = [1, 1]} : vector<2x96xf32> to vector<2x32xf32>
    %215 = vector.extract_strided_slice %200 {offsets = [0, 64], sizes = [2, 32], strides = [1, 1]} : vector<2x96xf32> to vector<2x32xf32>
    %216 = arith.mulf %212, %215 : vector<2x32xf32>
    %217 = arith.addf %214, %216 : vector<2x32xf32>
    %218 = math.tanh %217 : vector<2x32xf32>
    %cst_58 = arith.constant 1.000000e+00 : f32
    %219 = vector.broadcast %cst_58 : f32 to vector<2x32xf32>
    %220 = arith.subf %219, %213 : vector<2x32xf32>
    %221 = arith.mulf %220, %218 : vector<2x32xf32>
    %222 = arith.mulf %213, %191 : vector<2x32xf32>
    %223 = arith.addf %221, %222 : vector<2x32xf32>
    %cst_59 = arith.constant 0.000000e+00 : f32
    %224 = vector.broadcast %cst_59 : f32 to vector<2x32xf32>
    %225 = arith.maximumf %223, %224 : vector<2x32xf32>
    %226 = arith.index_cast %c6_i32 : i32 to index
    %c0_60 = arith.constant 0 : index
    %c0_61 = arith.constant 0 : index
    %227 = vector.load %arg4[%226, %c0_60, %c0_61] : memref<8x2x32xf32, #tpu.memory_space<vmem>>, vector<1x2x32xf32>
    %228 = vector.shape_cast %227 : vector<1x2x32xf32> to vector<2x32xf32>
    %229 = vector.shape_cast %225 : vector<2x32xf32> to vector<1x2x32xf32>
    tpu.vector_store %arg4[%226, %c0_60, %c0_61], %229 {strides = array<i32>} : memref<8x2x32xf32, #tpu.memory_space<vmem>>, vector<1x2x32xf32>,
    %c7_i32 = arith.constant 7 : i32
    %cst_62 = arith.constant dense<0.000000e+00> : vector<2x96xf32>
    %230 = tpu.matmul %223, %3, %cst_62 {dimension_numbers = #tpu.dot_dimension_numbers<[1], [0], [0], [1], [0, 0, 1, 1], [], []>} : vector<2x32xf32>, vector<32x96xf32>, vector<2x96xf32> -> vector<2x96xf32>
    %231 = vector.broadcast %4 : vector<1x96xf32> to vector<2x96xf32>
    %232 = arith.addf %230, %231 : vector<2x96xf32>
    %233 = arith.index_cast %c7_i32 : i32 to index
    %c0_63 = arith.constant 0 : index
    %c0_64 = arith.constant 0 : index
    %234 = vector.load %arg1[%233, %c0_63, %c0_64] : memref<8x2x96xf32, #tpu.memory_space<vmem>>, vector<1x2x96xf32>
    %235 = vector.shape_cast %234 : vector<1x2x96xf32> to vector<2x96xf32>
    %236 = vector.extract_strided_slice %235 {offsets = [0, 0], sizes = [2, 64], strides = [1, 1]} : vector<2x96xf32> to vector<2x64xf32>
    %237 = vector.extract_strided_slice %232 {offsets = [0, 0], sizes = [2, 64], strides = [1, 1]} : vector<2x96xf32> to vector<2x64xf32>
    %238 = arith.addf %236, %237 : vector<2x64xf32>
    %239 = arith.negf %238 : vector<2x64xf32>
    %240 = math.exp %239 : vector<2x64xf32>
    %cst_65 = arith.constant 1.000000e+00 : f32
    %241 = vector.broadcast %cst_65 : f32 to vector<2x64xf32>
    %242 = arith.addf %241, %240 : vector<2x64xf32>
    %243 = arith.divf %241, %242 : vector<2x64xf32>
    %244 = vector.extract_strided_slice %243 {offsets = [0, 0], sizes = [2, 32], strides = [1, 1]} : vector<2x64xf32> to vector<2x32xf32>
    %245 = vector.extract_strided_slice %243 {offsets = [0, 32], sizes = [2, 32], strides = [1, 1]} : vector<2x64xf32> to vector<2x32xf32>
    %246 = vector.extract_strided_slice %235 {offsets = [0, 64], sizes = [2, 32], strides = [1, 1]} : vector<2x96xf32> to vector<2x32xf32>
    %247 = vector.extract_strided_slice %232 {offsets = [0, 64], sizes = [2, 32], strides = [1, 1]} : vector<2x96xf32> to vector<2x32xf32>
    %248 = arith.mulf %244, %247 : vector<2x32xf32>
    %249 = arith.addf %246, %248 : vector<2x32xf32>
    %250 = math.tanh %249 : vector<2x32xf32>
    %cst_66 = arith.constant 1.000000e+00 : f32
    %251 = vector.broadcast %cst_66 : f32 to vector<2x32xf32>
    %252 = arith.subf %251, %245 : vector<2x32xf32>
    %253 = arith.mulf %252, %250 : vector<2x32xf32>
    %254 = arith.mulf %245, %223 : vector<2x32xf32>
    %255 = arith.addf %253, %254 : vector<2x32xf32>
    %cst_67 = arith.constant 0.000000e+00 : f32
    %256 = vector.broadcast %cst_67 : f32 to vector<2x32xf32>
    %257 = arith.maximumf %255, %256 : vector<2x32xf32>
    %258 = arith.index_cast %c7_i32 : i32 to index
    %c0_68 = arith.constant 0 : index
    %c0_69 = arith.constant 0 : index
    %259 = vector.load %arg4[%258, %c0_68, %c0_69] : memref<8x2x32xf32, #tpu.memory_space<vmem>>, vector<1x2x32xf32>
    %260 = vector.shape_cast %259 : vector<1x2x32xf32> to vector<2x32xf32>
    %261 = vector.shape_cast %257 : vector<2x32xf32> to vector<1x2x32xf32>
    tpu.vector_store %arg4[%258, %c0_68, %c0_69], %261 {strides = array<i32>} : memref<8x2x32xf32, #tpu.memory_space<vmem>>, vector<1x2x32xf32>,
    %c8_i32 = arith.constant 8 : i32
    %c0_70 = arith.constant 0 : index
    %c0_71 = arith.constant 0 : index
    %262 = vector.load %arg5[%c0_70, %c0_71] : memref<2x32xf32, #tpu.memory_space<vmem>>, vector<2x32xf32>
    tpu.vector_store %arg5[%c0_70, %c0_71], %255 {strides = array<i32>} : memref<2x32xf32, #tpu.memory_space<vmem>>, vector<2x32xf32>,
    return
  }
  func.func @transform_0(%arg0: i32) -> (i32, i32, i32) {
    %c0_i32 = arith.constant 0 : i32
    %c0_i32_0 = arith.constant 0 : i32
    %c0_i32_1 = arith.constant 0 : i32
    return %arg0, %c0_i32, %c0_i32_0 : i32, i32, i32
  }
  func.func @transform_1(%arg0: i32) -> (i32, i32) {
    %c0_i32 = arith.constant 0 : i32
    %c0_i32_0 = arith.constant 0 : i32
    %c0_i32_1 = arith.constant 0 : i32
    return %c0_i32, %c0_i32_0 : i32, i32
  }
  func.func @transform_2(%arg0: i32) -> (i32, i32) {
    %c0_i32 = arith.constant 0 : i32
    %c0_i32_0 = arith.constant 0 : i32
    %c0_i32_1 = arith.constant 0 : i32
    return %c0_i32, %c0_i32_0 : i32, i32
  }
  func.func @transform_3(%arg0: i32) -> (i32, i32, i32) {
    %c0_i32 = arith.constant 0 : i32
    %c0_i32_0 = arith.constant 0 : i32
    %c0_i32_1 = arith.constant 0 : i32
    return %arg0, %c0_i32, %c0_i32_0 : i32, i32, i32
  }
}

</mosaic_0001>

<bundles_post_ra>
// kernel: vencoder_forward.1
= control target key start
LH: loop header
LB: loop body
LE: loop exit
PB: predicated region body
PF: predicated region fallthrough
CT: control target
= control target key end

     0   :  { %vm18_vm0 = vcmask 254976   ;;  %v1134_v0 = vmov 0.0   ;;  %vm1135_vm1 = vmmov 0   ;;  %vm32_vm2 = vcmask 261120   ;;  %s1136_s21 = smov 64   ;;  %s1138_s24 = smov 32   ;;  %s1409_s1 = inlined_call_operand.vmem [shape: f32[32,96], index: 1, kind: input, shape index: {}]   ;;  %s1410_s2 = inlined_call_operand.vmem [shape: f32[1,96], index: 2, kind: input, shape index: {}]   ;;  %s1411_s0 = inlined_call_operand.vmem [shape: f32[8,2,96], index: 0, kind: input, shape index: {}]   ;;  %s1412_s3 = inlined_call_operand.vmem [shape: f32[8,2,32], index: 3, kind: output, shape index: {}]  }
   0x1   :  { %993 = vmatprep.subr.mxu0 %v1134_v0  ;;  %v1163_v1 = vld [vmem:[%s1409_s1 + $0x18] sm:$0xff]  ;;  %v1168_v2 = vld [vmem:[%s1409_s1 + $0x10] sm:$0xff]  ;;  %1001 = vmatprep.mubr.msk.f32.mxu0 %vm1135_vm1, %v1134_v0  ;;  %19 = vst.msk [vmem:[#allocation2] sm:$0x3] %vm18_vm0, %v1134_v0  ;;  %v1180_v3 = vld [vmem:[%s1409_s1 + $0x8] sm:$0xff] }
   0x2   :  { %994 = vmatpush3.msra.mxu0 %v1163_v1  ;;  %1004 = vmatprep.subr.mxu1 %v1134_v0  ;;  %v1189_v4 = vld [vmem:[%s1409_s1] sm:$0xff] }
   0x3   :  { %995 = vmatprep.subr.mxu0 %v1134_v0  ;;  %1005 = vmatpush3.msra.mxu1 %v1163_v1  ;;  %v1217_v6 = vld [vmem:[%s1410_s2] ss:$0 sm:$0xff]  ;;  %s1137_s2 = smov 96   ;;  %v926_v31 = vld [vmem:[%s1411_s0 + $0x2] sm:$0x3] }
   0x4   :  { %996 = vmatpush3.msra.mxu0 %v1168_v2  ;;  %1006 = vmatprep.subr.mxu1 %v1134_v0  ;;  %v106_v10 = vld [vmem:[%s1411_s0] sm:$0x3]  ;;  %v930_v51 = vld [vmem:[%s1411_s0 + $0x4] sm:$0x3] }
   0x5   :  { %997 = vmatprep.subr.mxu0 %v1134_v0  ;;  %1007 = vmatpush3.msra.mxu1 %v1168_v2 }
   0x6   :  { %998 = vmatpush3.msra.mxu0 %v1180_v3  ;;  %1008 = vmatprep.subr.mxu1 %v1134_v0 }
   0x7   :  { %999 = vmatprep.subr.mxu0 %v1134_v0  ;;  %1009 = vmatpush3.msra.mxu1 %v1180_v3 }
   0x8   :  { %1000 = vmatpush3.msra.mxu0 %v1189_v4  ;;  %v25_v5 = vld [vmem:[#allocation2] sm:$0x3]  ;;  %1010 = vmatprep.subr.mxu1 %v1134_v0 }
   0x9   :  { %1002 = vmatmul.mubr.msk.f32.vlgmr.msra.gmra.mxu0 %vm32_vm2, %v25_v5  ;;  %1011 = vmatpush3.msra.mxu1 %v1189_v4 }
   0xa   :  { %1012 = vmatprep.mubr.msk.f32.mxu1 %vm1135_vm1, %v1134_v0  ;;  %1015 = vmatprep.subr.mxu0 %v1134_v0 }
   0xb   :  { %1016 = vmatpush3.msra.mxu0 %v1163_v1  ;;  %1023 = vmatprep.mubr.msk.f32.mxu0 %vm1135_vm1, %v1134_v0 }
   0xc   :  { %1017 = vmatprep.subr.mxu0 %v1134_v0  ;;  %1026 = vmatprep.subr.mxu1 %v1134_v0 }
   0xd   :  { %1018 = vmatpush3.msra.mxu0 %v1168_v2 }
   0xe   :  { %1019 = vmatprep.subr.mxu0 %v1134_v0 }
   0xf   :  { %1020 = vmatpush3.msra.mxu0 %v1180_v3 }
  0x10   :  { %1021 = vmatprep.subr.mxu0 %v1134_v0 }
  0x11   :  { %1022 = vmatpush3.msra.mxu0 %v1189_v4 }
  0x12   :  { %1037 = vmatprep.subr.mxu0 %v1134_v0 }
  0xc9   :  { %v102_v7 = vpop.f32.mrf.mxu0 }
  0xca   :  { %v103_v8 = vadd.f32 %v1217_v6, %v102_v7 }
  0xcb   :  { %v1003_v9 = vpop.f32.mrf.mxu0 }
  0xcc   :  { %115 = vrot.lane.b32.xlu0 %v103_v8, %s1136_s21  ;;  %v107_v11 = vadd.f32 %v106_v10, %v103_v8 }
  0xce   :  { %v924_v12 = vmul.f32 -1.442695, %v107_v11 }
  0xd0   :  { %1086 = vpow2.f32 %v924_v12 }
  0xdd   :  { %v1087_v13 = vpop.eup %1086 }
  0xde   :  { %v111_v14 = vadd.f32 1.0, %v1087_v13  ;;  %v934_v13 = vld [vmem:[%s1411_s0 + $0x6] sm:$0x3] }
  0xe0   :  { %1088 = vrcp.f32 %v111_v14 }
  0xed   :  { %v1089_v15 = vpop.eup %1088 }
  0xee   :  { %v125_v22 = vsub.f32 1.0, %v1089_v15 }
 0x13e   :  { %v116_v16 = vpop.permute.xlu0 %115 }
 0x13f   :  { %v118_v17 = vmul.f32 %v1089_v15, %v116_v16 }
 0x141   :  { %120 = vrot.lane.b32.xlu0 %v118_v17, %s1136_s21 }
 0x1b3   :  { %v121_v18 = vpop.permute.xlu0 %120 }
 0x1b4   :  { %v123_v19 = vadd.f32 %v121_v18, %v106_v10 }
 0x1b6   :  { %1090 = vtanh.f32 %v123_v19 }
 0x1c3   :  { %v1091_v20 = vpop.eup %1090 }
 0x1c4   :  { %127 = vrot.lane.b32.xlu1 %v1091_v20, %s1137_s2 }
 0x1c8   :  { %131 = vrot.lane.b32.xlu1 %v25_v5, %s1138_s24 }
 0x236   :  { %v128_v21 = vpop.permute.xlu1 %127 }
 0x237   :  { %v130_v24 = vmul.f32 %v128_v21, %v125_v22 }
 0x23a   :  { %v132_v23 = vpop.permute.xlu1 %131 }
 0x23b   :  { %v134_v25 = vmul.f32 %v1089_v15, %v132_v23 }
 0x23d   :  { %v1226_v26 = vadd.f32 %v134_v25, %v130_v24 }
 0x23f   :  { %144 = vrot.lane.b32.xlu0 %v1226_v26, %s1137_s2 }
 0x2b1   :  { %v145_v27 = vpop.permute.xlu0 %144 }
 0x2b2   :  { %1013 = vmatmul.mubr.msk.f32.vlgmr.msra.gmra.mxu1 %vm32_vm2, %v145_v27 }
 0x2b3   :  { %1027 = vmatpush3.msra.mxu1 %v1163_v1  ;;  %1034 = vmatprep.mubr.msk.f32.mxu1 %vm1135_vm1, %v1134_v0 }
 0x2b4   :  { %1028 = vmatprep.subr.mxu1 %v1134_v0 }
 0x2b5   :  { %1029 = vmatpush3.msra.mxu1 %v1168_v2 }
 0x2b6   :  { %1030 = vmatprep.subr.mxu1 %v1134_v0 }
 0x2b7   :  { %1031 = vmatpush3.msra.mxu1 %v1180_v3 }
 0x2b8   :  { %1032 = vmatprep.subr.mxu1 %v1134_v0 }
 0x2b9   :  { %1033 = vmatpush3.msra.mxu1 %v1189_v4 }
 0x2ba   :  { %1048 = vmatprep.subr.mxu1 %v1134_v0 }
 0x372   :  { %v214_v28 = vpop.f32.mrf.mxu1 }
 0x373   :  { %v215_v29 = vadd.f32 %v1217_v6, %v214_v28 }
 0x374   :  { %v1014_v30 = vpop.f32.mrf.mxu1 }
 0x375   :  { %228 = vrot.lane.b32.xlu1 %v215_v29, %s1136_s21  ;;  %v220_v32 = vadd.f32 %v926_v31, %v215_v29 }
 0x377   :  { %v927_v33 = vmul.f32 -1.442695, %v220_v32 }
 0x379   :  { %1092 = vpow2.f32 %v927_v33 }
 0x386   :  { %v1093_v34 = vpop.eup %1092 }
 0x387   :  { %v224_v35 = vadd.f32 1.0, %v1093_v34  ;;  %v938_v34 = vld [vmem:[%s1411_s0 + $0x8] sm:$0x3] }
 0x389   :  { %1094 = vrcp.f32 %v224_v35 }
 0x396   :  { %v1095_v36 = vpop.eup %1094 }
 0x397   :  { %v238_v42 = vsub.f32 1.0, %v1095_v36  ;;  %v244_v44 = vmul.f32 %v1095_v36, %v1226_v26 }
 0x3e7   :  { %v229_v37 = vpop.permute.xlu1 %228 }
 0x3e8   :  { %v231_v38 = vmul.f32 %v1095_v36, %v229_v37 }
 0x3ea   :  { %233 = vrot.lane.b32.xlu0 %v231_v38, %s1136_s21 }
 0x45c   :  { %v234_v39 = vpop.permute.xlu0 %233 }
 0x45d   :  { %v236_v40 = vadd.f32 %v926_v31, %v234_v39 }
 0x45f   :  { %1096 = vtanh.f32 %v236_v40 }
 0x46c   :  { %v1097_v41 = vpop.eup %1096 }
 0x46d   :  { %240 = vrot.lane.b32.xlu1 %v1097_v41, %s1137_s2 }
 0x4df   :  { %v241_v43 = vpop.permute.xlu1 %240 }
 0x4e0   :  { %v243_v45 = vmul.f32 %v241_v43, %v238_v42 }
 0x4e2   :  { %v1249_v46 = vadd.f32 %v244_v44, %v243_v45 }
 0x4e4   :  { %254 = vrot.lane.b32.xlu0 %v1249_v46, %s1137_s2 }
 0x556   :  { %v255_v47 = vpop.permute.xlu0 %254 }
 0x557   :  { %1024 = vmatmul.mubr.msk.f32.vlgmr.msra.gmra.mxu0 %vm32_vm2, %v255_v47 }
 0x558   :  { %1038 = vmatpush3.msra.mxu0 %v1163_v1  ;;  %1045 = vmatprep.mubr.msk.f32.mxu0 %vm1135_vm1, %v1134_v0 }
 0x559   :  { %1039 = vmatprep.subr.mxu0 %v1134_v0 }
 0x55a   :  { %1040 = vmatpush3.msra.mxu0 %v1168_v2 }
 0x55b   :  { %1041 = vmatprep.subr.mxu0 %v1134_v0 }
 0x55c   :  { %1042 = vmatpush3.msra.mxu0 %v1180_v3 }
 0x55d   :  { %1043 = vmatprep.subr.mxu0 %v1134_v0 }
 0x55e   :  { %1044 = vmatpush3.msra.mxu0 %v1189_v4 }
 0x55f   :  { %1059 = vmatprep.subr.mxu0 %v1134_v0 }
 0x617   :  { %v324_v48 = vpop.f32.mrf.mxu0 }
 0x618   :  { %v325_v49 = vadd.f32 %v1217_v6, %v324_v48 }
 0x619   :  { %v1025_v50 = vpop.f32.mrf.mxu0 }
 0x61a   :  { %338 = vrot.lane.b32.xlu1 %v325_v49, %s1136_s21  ;;  %v330_v52 = vadd.f32 %v930_v51, %v325_v49 }
 0x61c   :  { %v931_v53 = vmul.f32 -1.442695, %v330_v52 }
 0x61e   :  { %1098 = vpow2.f32 %v931_v53 }
 0x62b   :  { %v1099_v54 = vpop.eup %1098 }
 0x62c   :  { %v334_v55 = vadd.f32 1.0, %v1099_v54 }
 0x62e   :  { %1100 = vrcp.f32 %v334_v55 }
 0x63b   :  { %v1101_v56 = vpop.eup %1100 }
 0x63c   :  { %v348_v62 = vsub.f32 1.0, %v1101_v56  ;;  %v354_v5 = vmul.f32 %v1101_v56, %v1249_v46 }
 0x68c   :  { %v339_v57 = vpop.permute.xlu1 %338 }
 0x68d   :  { %v341_v58 = vmul.f32 %v1101_v56, %v339_v57 }
 0x68f   :  { %343 = vrot.lane.b32.xlu0 %v341_v58, %s1136_s21 }
 0x701   :  { %v344_v59 = vpop.permute.xlu0 %343 }
 0x702   :  { %v346_v60 = vadd.f32 %v930_v51, %v344_v59 }
 0x704   :  { %1102 = vtanh.f32 %v346_v60 }
 0x711   :  { %v1103_v61 = vpop.eup %1102 }
 0x712   :  { %350 = vrot.lane.b32.xlu1 %v1103_v61, %s1137_s2 }
 0x784   :  { %v351_v63 = vpop.permute.xlu1 %350 }
 0x785   :  { %v353_v7 = vmul.f32 %v351_v63, %v348_v62 }
 0x787   :  { %v1272_v8 = vadd.f32 %v354_v5, %v353_v7 }
 0x789   :  { %364 = vrot.lane.b32.xlu0 %v1272_v8, %s1137_s2 }
 0x7fb   :  { %v365_v9 = vpop.permute.xlu0 %364 }
 0x7fc   :  { %1035 = vmatmul.mubr.msk.f32.vlgmr.msra.gmra.mxu1 %vm32_vm2, %v365_v9 }
 0x7fd   :  { %1049 = vmatpush3.msra.mxu1 %v1163_v1  ;;  %1056 = vmatprep.mubr.msk.f32.mxu1 %vm1135_vm1, %v1134_v0 }
 0x7fe   :  { %1050 = vmatprep.subr.mxu1 %v1134_v0 }
 0x7ff   :  { %1051 = vmatpush3.msra.mxu1 %v1168_v2 }
 0x800   :  { %1052 = vmatprep.subr.mxu1 %v1134_v0 }
 0x801   :  { %1053 = vmatpush3.msra.mxu1 %v1180_v3 }
 0x802   :  { %1054 = vmatprep.subr.mxu1 %v1134_v0 }
 0x803   :  { %1055 = vmatpush3.msra.mxu1 %v1189_v4 }
 0x804   :  { %1070 = vmatprep.subr.mxu1 %v1134_v0 }
 0x8bc   :  { %v434_v10 = vpop.f32.mrf.mxu1 }
 0x8bd   :  { %v435_v11 = vadd.f32 %v1217_v6, %v434_v10 }
 0x8be   :  { %v1036_v12 = vpop.f32.mrf.mxu1 }
 0x8bf   :  { %448 = vrot.lane.b32.xlu1 %v435_v11, %s1136_s21  ;;  %v440_v14 = vadd.f32 %v934_v13, %v435_v11 }
 0x8c1   :  { %v935_v15 = vmul.f32 -1.442695, %v440_v14 }
 0x8c3   :  { %1104 = vpow2.f32 %v935_v15 }
 0x8d0   :  { %v1105_v16 = vpop.eup %1104 }
 0x8d1   :  { %v444_v17 = vadd.f32 1.0, %v1105_v16 }
 0x8d3   :  { %1106 = vrcp.f32 %v444_v17 }
 0x8e0   :  { %v1107_v18 = vpop.eup %1106 }
 0x8e1   :  { %v458_v24 = vsub.f32 1.0, %v1107_v18  ;;  %v464_v27 = vmul.f32 %v1107_v18, %v1272_v8 }
 0x931   :  { %v449_v19 = vpop.permute.xlu1 %448 }
 0x932   :  { %v451_v20 = vmul.f32 %v1107_v18, %v449_v19 }
 0x934   :  { %453 = vrot.lane.b32.xlu0 %v451_v20, %s1136_s21 }
 0x9a6   :  { %v454_v21 = vpop.permute.xlu0 %453 }
 0x9a7   :  { %v456_v22 = vadd.f32 %v934_v13, %v454_v21  ;;  %v946_v13 = vld [vmem:[%s1411_s0 + $0xc] sm:$0x3] }
 0x9a9   :  { %1108 = vtanh.f32 %v456_v22 }
 0x9b6   :  { %v1109_v23 = vpop.eup %1108 }
 0x9b7   :  { %460 = vrot.lane.b32.xlu1 %v1109_v23, %s1137_s2 }
 0xa29   :  { %v461_v25 = vpop.permute.xlu1 %460 }
 0xa2a   :  { %v463_v28 = vmul.f32 %v461_v25, %v458_v24 }
 0xa2c   :  { %v1295_v29 = vadd.f32 %v464_v27, %v463_v28 }
 0xa2e   :  { %474 = vrot.lane.b32.xlu0 %v1295_v29, %s1137_s2 }
 0xaa0   :  { %v475_v30 = vpop.permute.xlu0 %474 }
 0xaa1   :  { %1046 = vmatmul.mubr.msk.f32.vlgmr.msra.gmra.mxu0 %vm32_vm2, %v475_v30 }
 0xaa2   :  { %1060 = vmatpush3.msra.mxu0 %v1163_v1  ;;  %1067 = vmatprep.mubr.msk.f32.mxu0 %vm1135_vm1, %v1134_v0 }
 0xaa3   :  { %1061 = vmatprep.subr.mxu0 %v1134_v0 }
 0xaa4   :  { %1062 = vmatpush3.msra.mxu0 %v1168_v2 }
 0xaa5   :  { %1063 = vmatprep.subr.mxu0 %v1134_v0 }
 0xaa6   :  { %1064 = vmatpush3.msra.mxu0 %v1180_v3 }
 0xaa7   :  { %1065 = vmatprep.subr.mxu0 %v1134_v0 }
 0xaa8   :  { %1066 = vmatpush3.msra.mxu0 %v1189_v4 }
 0xb61   :  { %v544_v31 = vpop.f32.mrf.mxu0 }
 0xb62   :  { %v545_v32 = vadd.f32 %v1217_v6, %v544_v31 }
 0xb63   :  { %v1047_v33 = vpop.f32.mrf.mxu0 }
 0xb64   :  { %558 = vrot.lane.b32.xlu1 %v545_v32, %s1136_s21  ;;  %v550_v35 = vadd.f32 %v938_v34, %v545_v32 }
 0xb66   :  { %v939_v36 = vmul.f32 -1.442695, %v550_v35  ;;  %v950_v35 = vld [vmem:[%s1411_s0 + $0xe] sm:$0x3] }
 0xb68   :  { %1110 = vpow2.f32 %v939_v36 }
 0xb75   :  { %v1111_v37 = vpop.eup %1110 }
 0xb76   :  { %v554_v38 = vadd.f32 1.0, %v1111_v37 }
 0xb78   :  { %1112 = vrcp.f32 %v554_v38 }
 0xb85   :  { %v1113_v39 = vpop.eup %1112 }
 0xb86   :  { %v568_v45 = vsub.f32 1.0, %v1113_v39  ;;  %v574_v48 = vmul.f32 %v1113_v39, %v1295_v29 }
 0xbd6   :  { %v559_v40 = vpop.permute.xlu1 %558 }
 0xbd7   :  { %v561_v41 = vmul.f32 %v1113_v39, %v559_v40 }
 0xbd9   :  { %563 = vrot.lane.b32.xlu0 %v561_v41, %s1136_s21 }
 0xc4b   :  { %v564_v42 = vpop.permute.xlu0 %563 }
 0xc4c   :  { %v566_v43 = vadd.f32 %v938_v34, %v564_v42 }
 0xc4e   :  { %1114 = vtanh.f32 %v566_v43  ;;  %v356_v43 = vmax.f32 %v1272_v8, 0.0 }
 0xc5b   :  { %v1115_v44 = vpop.eup %1114 }
 0xc5c   :  { %570 = vrot.lane.b32.xlu1 %v1115_v44, %s1137_s2 }
 0xcce   :  { %v571_v47 = vpop.permute.xlu1 %570 }
 0xccf   :  { %v573_v49 = vmul.f32 %v571_v47, %v568_v45 }
 0xcd1   :  { %v1317_v50 = vadd.f32 %v574_v48, %v573_v49 }
 0xcd3   :  { %584 = vrot.lane.b32.xlu0 %v1317_v50, %s1137_s2  ;;  %v576_v44 = vmax.f32 %v1317_v50, 0.0 }
 0xd45   :  { %v585_v51 = vpop.permute.xlu0 %584 }
 0xd46   :  { %1057 = vmatmul.mubr.msk.f32.vlgmr.msra.gmra.mxu1 %vm32_vm2, %v585_v51 }
 0xd47   :  { %1071 = vmatpush3.msra.mxu1 %v1163_v1  ;;  %1078 = vmatprep.mubr.msk.f32.mxu1 %vm1135_vm1, %v1134_v0  ;;  %v942_v1 = vld [vmem:[%s1411_s0 + $0xa] sm:$0x3] }
 0xd48   :  { %1072 = vmatprep.subr.mxu1 %v1134_v0 }
 0xd49   :  { %1073 = vmatpush3.msra.mxu1 %v1168_v2 }
 0xd4a   :  { %1074 = vmatprep.subr.mxu1 %v1134_v0 }
 0xd4b   :  { %1075 = vmatpush3.msra.mxu1 %v1180_v3 }
 0xd4c   :  { %1076 = vmatprep.subr.mxu1 %v1134_v0 }
 0xd4d   :  { %1077 = vmatpush3.msra.mxu1 %v1189_v4 }
 0xe06   :  { %v654_v52 = vpop.f32.mrf.mxu1 }
 0xe07   :  { %v655_v53 = vadd.f32 %v1217_v6, %v654_v52  ;;  %v246_v52 = vmax.f32 %v1249_v46, 0.0 }
 0xe08   :  { %v1058_v54 = vpop.f32.mrf.mxu1 }
 0xe09   :  { %668 = vrot.lane.b32.xlu1 %v655_v53, %s1136_s21  ;;  %v660_v55 = vadd.f32 %v942_v1, %v655_v53  ;;  %v466_v53 = vmax.f32 %v1295_v29, 0.0 }
 0xe0b   :  { %v943_v2 = vmul.f32 -1.442695, %v660_v55 }
 0xe0d   :  { %1116 = vpow2.f32 %v943_v2 }
 0xe1a   :  { %v1117_v56 = vpop.eup %1116 }
 0xe1b   :  { %v664_v57 = vadd.f32 1.0, %v1117_v56 }
 0xe1d   :  { %1118 = vrcp.f32 %v664_v57 }
 0xe2a   :  { %v1119_v3 = vpop.eup %1118 }
 0xe2b   :  { %v678_v61 = vsub.f32 1.0, %v1119_v3  ;;  %v684_v63 = vmul.f32 %v1119_v3, %v1317_v50 }
 0xe7b   :  { %v669_v0 = vpop.permute.xlu1 %668 }
 0xe7c   :  { %v671_v58 = vmul.f32 %v1119_v3, %v669_v0 }
 0xe7e   :  { %673 = vrot.lane.b32.xlu0 %v671_v58, %s1136_s21 }
 0xef0   :  { %v674_v4 = vpop.permute.xlu0 %673 }
 0xef1   :  { %v676_v59 = vadd.f32 %v942_v1, %v674_v4 }
 0xef3   :  { %1120 = vtanh.f32 %v676_v59 }
 0xf00   :  { %v1121_v60 = vpop.eup %1120 }
 0xf01   :  { %680 = vrot.lane.b32.xlu1 %v1121_v60, %s1137_s2 }
 0xf73   :  { %v681_v62 = vpop.permute.xlu1 %680 }
 0xf74   :  { %v683_v5 = vmul.f32 %v681_v62, %v678_v61 }
 0xf76   :  { %v1339_v7 = vadd.f32 %v684_v63, %v683_v5 }
 0xf78   :  { %694 = vrot.lane.b32.xlu0 %v1339_v7, %s1137_s2  ;;  %v686_v54 = vmax.f32 %v1339_v7, 0.0 }
 0xfea   :  { %v695_v9 = vpop.permute.xlu0 %694 }
 0xfeb   :  { %1068 = vmatmul.mubr.msk.f32.vlgmr.msra.gmra.mxu0 %vm32_vm2, %v695_v9 }
0x10ab   :  { %v764_v10 = vpop.f32.mrf.mxu0 }
0x10ac   :  { %v765_v11 = vadd.f32 %v1217_v6, %v764_v10 }
0x10ad   :  { %v1069_v12 = vpop.f32.mrf.mxu0 }
0x10ae   :  { %778 = vrot.lane.b32.xlu1 %v765_v11, %s1136_s21  ;;  %v770_v14 = vadd.f32 %v946_v13, %v765_v11 }
0x10b0   :  { %v947_v15 = vmul.f32 -1.442695, %v770_v14 }
0x10b2   :  { %1122 = vpow2.f32 %v947_v15 }
0x10bf   :  { %v1123_v16 = vpop.eup %1122 }
0x10c0   :  { %v774_v17 = vadd.f32 1.0, %v1123_v16 }
0x10c2   :  { %1124 = vrcp.f32 %v774_v17 }
0x10cf   :  { %v1125_v18 = vpop.eup %1124 }
0x10d0   :  { %v788_v24 = vsub.f32 1.0, %v1125_v18  ;;  %v794_v27 = vmul.f32 %v1125_v18, %v1339_v7 }
0x1120   :  { %v779_v19 = vpop.permute.xlu1 %778 }
0x1121   :  { %v781_v20 = vmul.f32 %v1125_v18, %v779_v19 }
0x1123   :  { %783 = vrot.lane.b32.xlu0 %v781_v20, %s1136_s21 }
0x1195   :  { %v784_v21 = vpop.permute.xlu0 %783 }
0x1196   :  { %v786_v22 = vadd.f32 %v946_v13, %v784_v21 }
0x1198   :  { %1126 = vtanh.f32 %v786_v22 }
0x11a5   :  { %v1127_v23 = vpop.eup %1126 }
0x11a6   :  { %790 = vrot.lane.b32.xlu1 %v1127_v23, %s1137_s2 }
0x1218   :  { %v791_v25 = vpop.permute.xlu1 %790 }
0x1219   :  { %v793_v28 = vmul.f32 %v791_v25, %v788_v24 }
0x121b   :  { %v795_v30 = vadd.f32 %v794_v27, %v793_v28 }
0x121d   :  { %804 = vrot.lane.b32.xlu0 %v795_v30, %s1137_s2  ;;  %v796_v45 = vmax.f32 %v795_v30, 0.0 }
0x128f   :  { %v805_v31 = vpop.permute.xlu0 %804 }
0x1290   :  { %1079 = vmatmul.mubr.msk.f32.vlgmr.msra.gmra.mxu1 %vm32_vm2, %v805_v31 }
0x1350   :  { %v874_v32 = vpop.f32.mrf.mxu1 }
0x1351   :  { %v875_v33 = vadd.f32 %v1217_v6, %v874_v32  ;;  %v136_v6 = vmax.f32 %v1226_v26, 0.0 }
0x1352   :  { %v1080_v34 = vpop.f32.mrf.mxu1 }
0x1353   :  { %888 = vrot.lane.b32.xlu1 %v875_v33, %s1136_s21  ;;  %v880_v36 = vadd.f32 %v950_v35, %v875_v33 }
0x1355   :  { %v951_v37 = vmul.f32 -1.442695, %v880_v36 }
0x1357   :  { %1128 = vpow2.f32 %v951_v37 }
0x1364   :  { %v1129_v38 = vpop.eup %1128 }
0x1365   :  { %v884_v39 = vadd.f32 1.0, %v1129_v38 }
0x1367   :  { %1130 = vrcp.f32 %v884_v39 }
0x1374   :  { %v1131_v40 = vpop.eup %1130 }
0x1375   :  { %v898_v1 = vsub.f32 1.0, %v1131_v40  ;;  %v904_v2 = vmul.f32 %v1131_v40, %v795_v30 }
0x13c5   :  { %v889_v41 = vpop.permute.xlu1 %888 }
0x13c6   :  { %v891_v42 = vmul.f32 %v1131_v40, %v889_v41 }
0x13c8   :  { %893 = vrot.lane.b32.xlu0 %v891_v42, %s1136_s21 }
0x13cc   :  { %138 = vrot.lane.b32.xlu0 %v136_v6, %s1137_s2 }
0x13d0   :  { %358 = vrot.lane.b32.xlu0 %v356_v43, %s1137_s2 }
0x13d4   :  { %578 = vrot.lane.b32.xlu0 %v576_v44, %s1137_s2 }
0x13d8   :  { %798 = vrot.lane.b32.xlu0 %v796_v45, %s1137_s2 }
0x143a   :  { %v894_v47 = vpop.permute.xlu0 %893 }
0x143b   :  { %v896_v48 = vadd.f32 %v950_v35, %v894_v47 }
0x143d   :  { %1132 = vtanh.f32 %v896_v48 }
0x143e   :  { %v139_v49 = vpop.permute.xlu0 %138 }
0x143f   :  { %142 = vst.msk [vmem:[%s1412_s3] sm:$0x3] %vm18_vm0, %v139_v49 }
0x1442   :  { %v359_v26 = vpop.permute.xlu0 %358 }
0x1443   :  { %932 = vst.msk [vmem:[%s1412_s3 + $0x4] sm:$0x3] %vm18_vm0, %v359_v26 }
0x1446   :  { %v579_v8 = vpop.permute.xlu0 %578 }
0x1447   :  { %940 = vst.msk [vmem:[%s1412_s3 + $0x8] sm:$0x3] %vm18_vm0, %v579_v8 }
0x144a   :  { %v1133_v50 = vpop.eup %1132  ;;  %v799_v51 = vpop.permute.xlu0 %798 }
0x144b   :  { %948 = vst.msk [vmem:[%s1412_s3 + $0xc] sm:$0x3] %vm18_vm0, %v799_v51  ;;  %900 = vrot.lane.b32.xlu1 %v1133_v50, %s1137_s2 }
0x144f   :  { %248 = vrot.lane.b32.xlu1 %v246_v52, %s1137_s2 }
0x1453   :  { %468 = vrot.lane.b32.xlu1 %v466_v53, %s1137_s2 }
0x1457   :  { %688 = vrot.lane.b32.xlu1 %v686_v54, %s1137_s2 }
0x14bd   :  { %v901_v55 = vpop.permute.xlu1 %900 }
0x14be   :  { %v903_v56 = vmul.f32 %v901_v55, %v898_v1 }
0x14c0   :  { %v905_v57 = vadd.f32 %v904_v2, %v903_v56 }
0x14c1   :  { %v249_v3 = vpop.permute.xlu1 %248 }
0x14c2   :  { %928 = vst.msk [vmem:[%s1412_s3 + $0x2] sm:$0x3] %vm18_vm0, %v249_v3  ;;  %914 = vrot.lane.b32.xlu0 %v905_v57, %s1137_s2  ;;  %v906_v46 = vmax.f32 %v905_v57, 0.0 }
0x14c4   :  { %908 = vrot.lane.b32.xlu1 %v906_v46, %s1137_s2 }
0x14c5   :  { %v469_v29 = vpop.permute.xlu1 %468 }
0x14c6   :  { %936 = vst.msk [vmem:[%s1412_s3 + $0x6] sm:$0x3] %vm18_vm0, %v469_v29 }
0x14c9   :  { %v689_v0 = vpop.permute.xlu1 %688 }
0x14ca   :  { %944 = vst.msk [vmem:[%s1412_s3 + $0xa] sm:$0x3] %vm18_vm0, %v689_v0 }
0x1534   :  { %v915_v58 = vpop.permute.xlu0 %914 }
0x1535   :  { %917 = vst.msk [vmem:[#allocation2] sm:$0x3] %vm18_vm0, %v915_v58 }
0x1536   :  { %v909_v4 = vpop.permute.xlu1 %908 }
0x1537   :  { %952 = vst.msk [vmem:[%s1412_s3 + $0xe] sm:$0x3] %vm18_vm0, %v909_v4 }

</bundles_post_ra>
